<compile_context>
chip_gen: v5e
topology: v5e:2x2
jax: 0.10.0
libtpu: 0.0.40
codegen_flags: <defaults>
</compile_context>

<pallas_src>
import jax
import jax.numpy as jnp
from jax.experimental import pallas as pl
from jax.experimental.pallas import tpu as pltpu

HIDDEN = 256
LANE = 128
SMALL_BATCH_FASTPATH = 256


def _round_up(n, m):
    return ((n + m - 1) // m) * m


def actor_kernel(x_ref, w1_ref, b1_ref, w2_ref, b2_ref, w3_ref, b3_ref, o_ref):
    """Fused 3-layer MLP for one batch tile.

    x arrives f32 and is cast to the MXU compute dtype (bf16) in-kernel.
    Matmuls run on the MXU with f32 accumulation; bias add + ReLU stay f32 on
    the VPU (v5e has no bf16 VALU path).
    """
    cdt = w1_ref.dtype  # MXU compute dtype (bf16)
    x = x_ref[...].astype(cdt)
    h1 = jnp.dot(x, w1_ref[...], preferred_element_type=jnp.float32)
    h1 = jnp.maximum(h1 + b1_ref[...], 0.0)
    h2 = jnp.dot(h1.astype(cdt), w2_ref[...], preferred_element_type=jnp.float32)
    h2 = jnp.maximum(h2 + b2_ref[...], 0.0)
    out = jnp.dot(h2.astype(cdt), w3_ref[...], preferred_element_type=jnp.float32)
    o_ref[...] = (out + b3_ref[...]).astype(o_ref.dtype)


def init_params(key, obs_dim, act_dim, hidden=HIDDEN):
    """PyTorch nn.Linear-style init U(-1/sqrt(fan_in), 1/sqrt(fan_in)).
    Weights stored [in, out] (pre-transposed for x @ W); biases [1, out]."""
    keys = jax.random.split(key, 6)

    def linear(kw, kb, fan_in, fan_out):
        bound = 1.0 / jnp.sqrt(fan_in)
        w = jax.random.uniform(kw, (fan_in, fan_out), jnp.float32, -bound, bound)
        b = jax.random.uniform(kb, (1, fan_out), jnp.float32, -bound, bound)
        return w, b

    w1, b1 = linear(keys[0], keys[1], obs_dim, hidden)
    w2, b2 = linear(keys[2], keys[3], hidden, hidden)
    w3, b3 = linear(keys[4], keys[5], hidden, act_dim)
    return {"w1": w1, "b1": b1, "w2": w2, "b2": b2, "w3": w3, "b3": b3}


def prepare_params(params, compute_dtype=jnp.bfloat16):
    """Cast matmul weights to the MXU compute dtype.  Only w3/b3 are
    zero-padded on the act axis (to a multiple of 128) for lane-dense output
    stores; w1 stays unpadded (obs_dim, 256).  Biases stay f32."""
    w1, b1 = params["w1"], params["b1"]
    w2, b2 = params["w2"], params["b2"]
    w3, b3 = params["w3"], params["b3"]
    hidden = w1.shape[1]
    act_dim = w3.shape[1]
    act_p = _round_up(act_dim, LANE)

    w3p = jnp.zeros((hidden, act_p), compute_dtype).at[:, :act_dim].set(
        w3.astype(compute_dtype))
    b3p = jnp.zeros((1, act_p), jnp.float32).at[:, :act_dim].set(
        b3.astype(jnp.float32))

    return {
        "w1": w1.astype(compute_dtype), "b1": b1.astype(jnp.float32),
        "w2": w2.astype(compute_dtype), "b2": b2.astype(jnp.float32),
        "w3": w3p, "b3": b3p,
    }


def actor_forward(x, prep, act_dim, *, batch_tile=1024,
                  out_dtype=jnp.float32, trim_output=True):
    """x: [B, obs_dim] float32. prep: output of prepare_params.
    Returns [B, act_dim] (out_dtype); pass out_dtype=bf16 on v6e/v7x to halve
    output writeback, trim_output=False to let the consumer fuse the lane
    slice."""
    w1, b1 = prep["w1"], prep["b1"]
    w2, b2 = prep["w2"], prep["b2"]
    w3, b3 = prep["w3"], prep["b3"]

    B, obs_dim = x.shape
    hidden = w1.shape[1]
    act_p = w3.shape[1]

    cost = pl.CostEstimate(
        flops=2 * B * (obs_dim * hidden + hidden * hidden + hidden * act_p),
        transcendentals=0,
        bytes_accessed=(x.size * x.dtype.itemsize
                        + (w1.size + w2.size + w3.size) * 2
                        + (b1.size + b2.size + b3.size) * 4
                        + B * act_p * jnp.dtype(out_dtype).itemsize),
    )

    if B <= SMALL_BATCH_FASTPATH:
        # No-grid fast path: whole operands live in VMEM, no batch padding,
        # no grid bookkeeping.  Dominant regime for RL actor rollouts.
        out_p = pl.pallas_call(
            actor_kernel,
            out_shape=jax.ShapeDtypeStruct((B, act_p), out_dtype),
            cost_estimate=cost,
        )(x, w1, b1, w2, b2, w3, b3)
        return out_p[:, :act_dim] if trim_output else out_p

    # Grid path for large batches: 1-D grid over batch tiles; weights/biases
    # use constant index_maps (fetched once, VMEM-resident).
    # tb chosen so the grid has >= 2 steps (both v7x TensorCores busy),
    # multiple of 16 for sublane packing, capped at batch_tile.
    tb = min(batch_tile, _round_up(pl.cdiv(B, 2), 16))
    b_pad = _round_up(B, tb)
    xp = x if b_pad == B else jnp.zeros((b_pad, obs_dim), x.dtype).at[:B].set(x)

    out_p = pl.pallas_call(
        actor_kernel,
        out_shape=jax.ShapeDtypeStruct((b_pad, act_p), out_dtype),
        grid=(b_pad // tb,),
        in_specs=[
            # x tile: pipelined (double-buffered) across the batch grid,
            # unpadded feature dim (== full array dim, so legal even if <128).
            pl.BlockSpec((tb, obs_dim), lambda i: (i, 0)),
            # Weights / biases: constant index_map -> no re-DMA per step.
            pl.BlockSpec((obs_dim, hidden), lambda i: (0, 0)),
            pl.BlockSpec((1, hidden), lambda i: (0, 0)),
            pl.BlockSpec((hidden, hidden), lambda i: (0, 0)),
            pl.BlockSpec((1, hidden), lambda i: (0, 0)),
            pl.BlockSpec((hidden, act_p), lambda i: (0, 0)),
            pl.BlockSpec((1, act_p), lambda i: (0, 0)),
        ],
        out_specs=pl.BlockSpec((tb, act_p), lambda i: (i, 0)),
        compiler_params=pltpu.CompilerParams(
            dimension_semantics=("parallel",),
        ),
        cost_estimate=cost,
    )(xp, w1, b1, w2, b2, w3, b3)

    if b_pad != B:
        out_p = out_p[:B]
    return out_p[:, :act_dim] if trim_output else out_p


def actor_forward_ref(x, p, compute_dtype):
    """Plain-JAX reference mirroring the kernel math (compute_dtype matmul
    operands, f32 accumulation, f32 bias+ReLU)."""
    cdt = compute_dtype
    h1 = jnp.maximum(
        jnp.dot(x.astype(cdt), p["w1"].astype(cdt),
                preferred_element_type=jnp.float32) + p["b1"], 0.0)
    h2 = jnp.maximum(
        jnp.dot(h1.astype(cdt), p["w2"].astype(cdt),
                preferred_element_type=jnp.float32) + p["b2"], 0.0)
    return (jnp.dot(h2.astype(cdt), p["w3"].astype(cdt),
                    preferred_element_type=jnp.float32) + p["b3"])


if __name__ == "__main__":
    key = jax.random.PRNGKey(0)
    k_param, k_x, k_x2 = jax.random.split(key, 3)

    obs_dim, act_dim = 32, 8
    params = init_params(k_param, obs_dim, act_dim)
    prep = prepare_params(params)

    # --- Small-batch fast path (no-grid) ---
    batch = 8
    x = jax.random.normal(k_x, (batch, obs_dim), jnp.float32)
    out = jax.block_until_ready(actor_forward(x, prep, act_dim))
    assert out.shape == (batch, act_dim)
    assert out.dtype == jnp.float32

    ref_bf16 = actor_forward_ref(x, params, jnp.bfloat16)
    assert jnp.allclose(out, ref_bf16, atol=2e-3, rtol=2e-3)
    ref_f32 = actor_forward_ref(x, params, jnp.float32)
    assert jnp.allclose(out, ref_f32, atol=1e-1, rtol=1e-1)

    # bf16-output variant (v6e/v7x writeback-halving option).
    out_bf16 = jax.block_until_ready(
        actor_forward(x, prep, act_dim, out_dtype=jnp.bfloat16))
    assert out_bf16.dtype == jnp.bfloat16
    assert jnp.allclose(out_bf16.astype(jnp.float32), ref_bf16,
                        atol=2e-2, rtol=2e-2)

    # --- Grid path (B > fast-path threshold), still small overall ---
    batch2 = 512
    x2 = jax.random.normal(k_x2, (batch2, obs_dim), jnp.float32)
    out2 = jax.block_until_ready(actor_forward(x2, prep, act_dim))
    assert out2.shape == (batch2, act_dim)
    ref2 = actor_forward_ref(x2, params, jnp.bfloat16)
    assert jnp.allclose(out2, ref2, atol=3e-3, rtol=3e-3)

    print("KERNEL_OK")
</pallas_src>

<mosaic_0001>
module attributes {stable_mosaic.version = 11 : i64} {
  func.func @actor_kernel(%arg0: memref<8x32xf32, #tpu.memory_space<vmem>>, %arg1: memref<32x256xbf16, #tpu.memory_space<vmem>>, %arg2: memref<1x256xf32, #tpu.memory_space<vmem>>, %arg3: memref<256x256xbf16, #tpu.memory_space<vmem>>, %arg4: memref<1x256xf32, #tpu.memory_space<vmem>>, %arg5: memref<256x128xbf16, #tpu.memory_space<vmem>>, %arg6: memref<1x128xf32, #tpu.memory_space<vmem>>, %arg7: memref<8x128xf32, #tpu.memory_space<vmem>>) attributes {dimension_semantics = [], scalar_prefetch = 0 : i64, scratch_operands = 0 : i64, tpu.core_type = #tpu.core_type<tc>} {
    %c0 = arith.constant 0 : index
    %c0_0 = arith.constant 0 : index
    %0 = vector.load %arg0[%c0, %c0_0] : memref<8x32xf32, #tpu.memory_space<vmem>>, vector<8x32xf32>
    %1 = arith.truncf %0 : vector<8x32xf32> to vector<8x32xbf16>
    %c0_1 = arith.constant 0 : index
    %c0_2 = arith.constant 0 : index
    %2 = vector.load %arg1[%c0_1, %c0_2] : memref<32x256xbf16, #tpu.memory_space<vmem>>, vector<32x256xbf16>
    %cst = arith.constant dense<0.000000e+00> : vector<8x256xf32>
    %3 = tpu.matmul %1, %2, %cst {dimension_numbers = #tpu.dot_dimension_numbers<[1], [0], [0], [1], [0, 0, 1, 1], [], []>} : vector<8x32xbf16>, vector<32x256xbf16>, vector<8x256xf32> -> vector<8x256xf32>
    %c0_3 = arith.constant 0 : index
    %c0_4 = arith.constant 0 : index
    %4 = vector.load %arg2[%c0_3, %c0_4] : memref<1x256xf32, #tpu.memory_space<vmem>>, vector<1x256xf32>
    %5 = vector.broadcast %4 : vector<1x256xf32> to vector<8x256xf32>
    %6 = arith.addf %3, %5 : vector<8x256xf32>
    %cst_5 = arith.constant 0.000000e+00 : f32
    %7 = vector.broadcast %cst_5 : f32 to vector<8x256xf32>
    %8 = arith.maximumf %6, %7 : vector<8x256xf32>
    %9 = arith.truncf %8 : vector<8x256xf32> to vector<8x256xbf16>
    %c0_6 = arith.constant 0 : index
    %c0_7 = arith.constant 0 : index
    %10 = vector.load %arg3[%c0_6, %c0_7] : memref<256x256xbf16, #tpu.memory_space<vmem>>, vector<256x256xbf16>
    %cst_8 = arith.constant dense<0.000000e+00> : vector<8x256xf32>
    %11 = tpu.matmul %9, %10, %cst_8 {dimension_numbers = #tpu.dot_dimension_numbers<[1], [0], [0], [1], [0, 0, 1, 1], [], []>} : vector<8x256xbf16>, vector<256x256xbf16>, vector<8x256xf32> -> vector<8x256xf32>
    %c0_9 = arith.constant 0 : index
    %c0_10 = arith.constant 0 : index
    %12 = vector.load %arg4[%c0_9, %c0_10] : memref<1x256xf32, #tpu.memory_space<vmem>>, vector<1x256xf32>
    %13 = vector.broadcast %12 : vector<1x256xf32> to vector<8x256xf32>
    %14 = arith.addf %11, %13 : vector<8x256xf32>
    %cst_11 = arith.constant 0.000000e+00 : f32
    %15 = vector.broadcast %cst_11 : f32 to vector<8x256xf32>
    %16 = arith.maximumf %14, %15 : vector<8x256xf32>
    %17 = arith.truncf %16 : vector<8x256xf32> to vector<8x256xbf16>
    %c0_12 = arith.constant 0 : index
    %c0_13 = arith.constant 0 : index
    %18 = vector.load %arg5[%c0_12, %c0_13] : memref<256x128xbf16, #tpu.memory_space<vmem>>, vector<256x128xbf16>
    %cst_14 = arith.constant dense<0.000000e+00> : vector<8x128xf32>
    %19 = tpu.matmul %17, %18, %cst_14 {dimension_numbers = #tpu.dot_dimension_numbers<[1], [0], [0], [1], [0, 0, 1, 1], [], []>} : vector<8x256xbf16>, vector<256x128xbf16>, vector<8x128xf32> -> vector<8x128xf32>
    %c0_15 = arith.constant 0 : index
    %c0_16 = arith.constant 0 : index
    %20 = vector.load %arg6[%c0_15, %c0_16] : memref<1x128xf32, #tpu.memory_space<vmem>>, vector<1x128xf32>
    %21 = vector.broadcast %20 : vector<1x128xf32> to vector<8x128xf32>
    %22 = arith.addf %19, %21 : vector<8x128xf32>
    %c0_17 = arith.constant 0 : index
    %c0_18 = arith.constant 0 : index
    %23 = vector.load %arg7[%c0_17, %c0_18] : memref<8x128xf32, #tpu.memory_space<vmem>>, vector<8x128xf32>
    tpu.vector_store %arg7[%c0_17, %c0_18], %22 {strides = array<i32>} : memref<8x128xf32, #tpu.memory_space<vmem>>, vector<8x128xf32>,
    return
  }
}

</mosaic_0001>

<bundles_post_ra>
// kernel: tpu_custom_call.1
= control target key start
LH: loop header
LB: loop body
LE: loop exit
PB: predicated region body
PF: predicated region fallthrough
CT: control target
= control target key end

     0   :  { %12 = vsyncpa [#allocation3], 0  ;;  %s1101_s0 = inlined_call_operand.hbm [shape: f32[8,32], index: 0, kind: input, shape index: {}]   ;;  %s1102_s1 = inlined_call_operand.hbm [shape: bf16[32,256], index: 1, kind: input, shape index: {}]   ;;  %s1103_s2 = inlined_call_operand.hbm [shape: f32[1,256], index: 2, kind: input, shape index: {}]   ;;  %s1104_s3 = inlined_call_operand.hbm [shape: bf16[256,256], index: 3, kind: input, shape index: {}]   ;;  %s1105_s4 = inlined_call_operand.vmem [shape: f32[1,256], index: 4, kind: input, shape index: {}]   ;;  %s1106_s5 = inlined_call_operand.hbm [shape: bf16[256,128], index: 5, kind: input, shape index: {}]   ;;  %s1107_s6 = inlined_call_operand.vmem [shape: f32[1,128], index: 6, kind: input, shape index: {}]   ;;  %s1108_s7 = inlined_call_operand.hbm [shape: f32[8,128], index: 7, kind: output, shape index: {}]  }
   0x1   :  { %13 = vsyncpa [#allocation6], 0 }
   0x2   :  { %14 = vsyncpa [#allocation9], 0  ;;  %s31_s26 = sshll.u32 %s1102_s1, 4  ;;  %s32_s26 = int_to_ptr.hbm [resolvable:$true] %s31_s26 }
   0x3   :  { %15 = vsyncpa [#allocation4], 0  ;;  %s1025_s27 = smov [#allocation5]   ;;  %s55_s8 = sshll.u32 %s1104_s3, 4  ;;  %s56_s8 = int_to_ptr.hbm [resolvable:$true] %s55_s8 }
   0x4   :  { %s33_s28 = sshll.u32 %s1025_s27, 4  ;;  %s1026_s9 = smov 128   ;;  %s34_s28 = int_to_ptr.vmem [resolvable:$true] %s33_s28 }
   0x5   :  { %s1027_s10 = smov 8   ;;  %s1028_s11 = smov [#allocation8]  }
   0x6   :  { %39 = dma.hbm_to_vmem [thread:$0]  %s32_s26, 512, %s34_s28, [#allocation6], %s1026_s9, %s1026_s9, %s1027_s10  }
   0x7   :  { %s57_s12 = sshll.u32 %s1028_s11, 4  ;;  %s21_s15 = sshll.u32 %s1101_s0, 4  ;;  %s58_s12 = int_to_ptr.vmem [resolvable:$true] %s57_s12  ;;  %s22_s15 = int_to_ptr.hbm [resolvable:$true] %s21_s15 }
   0x8   :  { %63 = dma.hbm_to_vmem [thread:$0]  %s56_s8, 4096, %s58_s12, [#allocation9], %s1026_s9, %s1026_s9, %s1027_s10  }
   0x9   :  { %s45_s17 = sshll.u32 %s1103_s2, 4  ;;  %s1029_s18 = smov [#allocation2]   ;;  %s46_s17 = int_to_ptr.hbm [resolvable:$true] %s45_s17 }
   0xa   :  { %s23_s19 = sshll.u32 %s1029_s18, 4  ;;  %s1030_s3 = smov [#allocation7]   ;;  %s24_s19 = int_to_ptr.vmem [resolvable:$true] %s23_s19 }
   0xb   :  { %26 = dma.hbm_to_vmem [thread:$0]  %s22_s15, 128, %s24_s19, [#allocation3]  }
   0xc   :  { %s47_s20 = sshll.u32 %s1030_s3, 4  ;;  %s70_s23 = sshll.u32 %s1106_s5, 4  ;;  %s48_s20 = int_to_ptr.vmem [resolvable:$true] %s47_s20  ;;  %s71_s23 = int_to_ptr.hbm [resolvable:$true] %s70_s23 }
   0xd   :  { %50 = dma.hbm_to_vmem [thread:$0]  %s46_s17, 32, %s48_s20, [#allocation6]  }
   0xe   :  { %s1031_s0 = smov [#allocation10]   ;;  %s1032_s25 = smov 64  }
   0xf   :  { %s72_s24 = sshll.u32 %s1031_s0, 4  ;;  %s1033_s26 = smov 4   ;;  %s73_s24 = int_to_ptr.vmem [resolvable:$true] %s72_s24 }
  0x10   :  { %78 = dma.hbm_to_vmem [thread:$0]  %s71_s23, 2048, %s73_s24, [#allocation9], %s1032_s25, %s1032_s25, %s1033_s26  }
  0x11   :  { %1017 = dma.done.wait [#allocation3], 128  }
  0x12   :  { %1018 = vsyncadd [#allocation3], 4294967168 }
  0x13   :  { %1019 = dma.done.wait [#allocation6], 544  }
  0x14   :  { %1020 = vsyncadd [#allocation6], 4294966752 }
  0x15   :  { %1021 = dma.done.wait [#allocation9], 6144  }
  0x16   :  { %1022 = vsyncadd [#allocation9], 4294961152  ;;  %v610_v0 = vld [vmem:[#allocation5 + $0x10] sm:$0xf]  ;;  %v813_v1 = vld [vmem:[#allocation5 + $0x14] sm:$0xf0] }
  0x17   :  { %v812_v2 = vld [vmem:[#allocation5 + $0x14] sm:$0xf]  ;;  %v611_v3 = vor.u32 %v813_v1, %v610_v0  ;;  %v612_v4 = vld [vmem:[#allocation5 + $0x18] sm:$0xf0]  ;;  %v602_v5 = vld [vmem:[#allocation5] sm:$0xf] }
  0x18   :  { %v811_v6 = vld [vmem:[#allocation5 + $0x4] sm:$0xf0]  ;;  %v615_v7 = vor.u32 %v812_v2, %v612_v4  ;;  %v810_v8 = vld [vmem:[#allocation5 + $0x4] sm:$0xf]  ;;  %v604_v9 = vld [vmem:[#allocation5 + $0x8] sm:$0xf0] }
  0x19   :  { %v102_v10 = vld [vmem:[#allocation2] sm:$0xff]  ;;  %vm134_vm0 = vcmask 261120   ;;  %144 = vmatpush.bf16.msra.mxu0 %v611_v3  ;;  %v603_v11 = vor.u32 %v811_v6, %v602_v5  ;;  %v676_v12 = vld [vmem:[#allocation8 + $0x70] sm:$0xf]  ;;  %v607_v15 = vor.u32 %v810_v8, %v604_v9  ;;  %v668_v24 = vld [vmem:[#allocation8 + $0x60] sm:$0xf] }
  0x1a   :  { %v829_v13 = vld [vmem:[#allocation8 + $0x74] sm:$0xf0]  ;;  %v740_v14 = vld [vmem:[#allocation8 + $0xf0] sm:$0xf]  ;;  %157 = vmatpush.bf16.msra.mxu1 %v615_v7  ;;  %v828_v18 = vld [vmem:[#allocation8 + $0x74] sm:$0xf]  ;;  %v103_v25 = vpack.c.bf16 %v102_v10, %v102_v10 }
  0x1b   :  { %v677_v16 = vor.u32 %v829_v13, %v676_v12  ;;  %v845_v17 = vld [vmem:[#allocation8 + $0xf4] sm:$0xf0]  ;;  %v678_v19 = vld [vmem:[#allocation8 + $0x78] sm:$0xf0]  ;;  %v844_v22 = vld [vmem:[#allocation8 + $0xf4] sm:$0xf] }
  0x1c   :  { %v741_v20 = vor.u32 %v845_v17, %v740_v14  ;;  %v681_v21 = vor.u32 %v828_v18, %v678_v19  ;;  %v742_v23 = vld [vmem:[#allocation8 + $0xf8] sm:$0xf0]  ;;  %v827_v27 = vld [vmem:[#allocation8 + $0x64] sm:$0xf0]  ;;  %v732_v28 = vld [vmem:[#allocation8 + $0xe0] sm:$0xf] }
  0x1d   :  { %366 = vmatpush.bf16.msra.mxu2 %v677_v16  ;;  %v745_v26 = vor.u32 %v844_v22, %v742_v23  ;;  %v843_v29 = vld [vmem:[#allocation8 + $0xe4] sm:$0xf0]  ;;  %145 = vmatpush.bf16.msra.mxu0 %v603_v11  ;;  %v669_v30 = vor.u32 %v827_v27, %v668_v24  ;;  %v826_v32 = vld [vmem:[#allocation8 + $0x64] sm:$0xf]  ;;  %v670_v33 = vld [vmem:[#allocation8 + $0x68] sm:$0xf0] }
  0x1e   :  { %379 = vmatpush.bf16.msra.mxu3 %v741_v20  ;;  %v733_v31 = vor.u32 %v843_v29, %v732_v28  ;;  %v842_v34 = vld [vmem:[#allocation8 + $0xe4] sm:$0xf]  ;;  %158 = vmatpush.bf16.msra.mxu1 %v607_v15  ;;  %v673_v35 = vor.u32 %v826_v32, %v670_v33  ;;  %v734_v36 = vld [vmem:[#allocation8 + $0xe8] sm:$0xf0]  ;;  %v660_v37 = vld [vmem:[#allocation8 + $0x50] sm:$0xf] }
  0x1f   :  { %v825_v38 = vld [vmem:[#allocation8 + $0x54] sm:$0xf0]  ;;  %v737_v39 = vor.u32 %v842_v34, %v734_v36  ;;  %v724_v40 = vld [vmem:[#allocation8 + $0xd0] sm:$0xf]  ;;  %v824_v42 = vld [vmem:[#allocation8 + $0x54] sm:$0xf] }
  0x20   :  { %v841_v41 = vld [vmem:[#allocation8 + $0xd4] sm:$0xf0]  ;;  %616 = vmatmul.msk.bf16.vlgmr.msra.gmra.mxu0 %vm134_vm0, %v103_v25  ;;  %v661_v43 = vor.u32 %v825_v38, %v660_v37  ;;  %v662_v44 = vld [vmem:[#allocation8 + $0x58] sm:$0xf0]  ;;  %v840_v45 = vld [vmem:[#allocation8 + $0xd4] sm:$0xf] }
  0x21   :  { %392 = vmatpush.bf16.msrb.mxu0 %v681_v21  ;;  %367 = vmatpush.bf16.msra.mxu2 %v669_v30  ;;  %v726_v46 = vld [vmem:[#allocation8 + $0xd8] sm:$0xf0]  ;;  %v725_v47 = vor.u32 %v841_v41, %v724_v40  ;;  %v652_v48 = vld [vmem:[#allocation8 + $0x40] sm:$0xf]  ;;  %v823_v49 = vld [vmem:[#allocation8 + $0x44] sm:$0xf0]  ;;  %v665_v50 = vor.u32 %v824_v42, %v662_v44 }
  0x22   :  { %405 = vmatpush.bf16.msrb.mxu1 %v745_v26  ;;  %380 = vmatpush.bf16.msra.mxu3 %v733_v31  ;;  %v716_v51 = vld [vmem:[#allocation8 + $0xc0] sm:$0xf]  ;;  %v839_v52 = vld [vmem:[#allocation8 + $0xc4] sm:$0xf0]  ;;  %v729_v53 = vor.u32 %v840_v45, %v726_v46  ;;  %v822_v54 = vld [vmem:[#allocation8 + $0x44] sm:$0xf]  ;;  %v653_v56 = vor.u32 %v823_v49, %v652_v48 }
  0x23   :  { %617 = vmatmul.msk.bf16.vlgmr.msra.gmra.mxu1 %vm134_vm0, %v103_v25  ;;  %v654_v55 = vld [vmem:[#allocation8 + $0x48] sm:$0xf0]  ;;  %v838_v57 = vld [vmem:[#allocation8 + $0xc4] sm:$0xf]  ;;  %v717_v59 = vor.u32 %v839_v52, %v716_v51  ;;  %v644_v60 = vld [vmem:[#allocation8 + $0x30] sm:$0xf] }
  0x24   :  { %v718_v58 = vld [vmem:[#allocation8 + $0xc8] sm:$0xf0]  ;;  %v821_v61 = vld [vmem:[#allocation8 + $0x34] sm:$0xf0]  ;;  %v657_v62 = vor.u32 %v822_v54, %v654_v55  ;;  %v708_v63 = vld [vmem:[#allocation8 + $0xb0] sm:$0xf] }
  0x25   :  { %393 = vmatpush.bf16.msrb.mxu0 %v673_v35  ;;  %368 = vmatpush.bf16.msra.mxu2 %v661_v43  ;;  %v837_v0 = vld [vmem:[#allocation8 + $0xb4] sm:$0xf0]  ;;  %v721_v1 = vor.u32 %v838_v57, %v718_v58  ;;  %v820_v2 = vld [vmem:[#allocation8 + $0x34] sm:$0xf]  ;;  %v646_v3 = vld [vmem:[#allocation8 + $0x38] sm:$0xf0]  ;;  %v645_v4 = vor.u32 %v821_v61, %v644_v60 }
  0x26   :  { %406 = vmatpush.bf16.msrb.mxu1 %v737_v39  ;;  %381 = vmatpush.bf16.msra.mxu3 %v725_v47  ;;  %v836_v5 = vld [vmem:[#allocation8 + $0xb4] sm:$0xf]  ;;  %v710_v6 = vld [vmem:[#allocation8 + $0xb8] sm:$0xf0]  ;;  %v709_v7 = vor.u32 %v837_v0, %v708_v63  ;;  %v636_v8 = vld [vmem:[#allocation8 + $0x20] sm:$0xf]  ;;  %v649_v10 = vor.u32 %v820_v2, %v646_v3 }
  0x27   :  { %v819_v9 = vld [vmem:[#allocation8 + $0x24] sm:$0xf0]  ;;  %v700_v11 = vld [vmem:[#allocation8 + $0xa0] sm:$0xf]  ;;  %v713_v13 = vor.u32 %v836_v5, %v710_v6  ;;  %v818_v14 = vld [vmem:[#allocation8 + $0x24] sm:$0xf] }
  0x28   :  { %v835_v12 = vld [vmem:[#allocation8 + $0xa4] sm:$0xf0]  ;;  %v638_v15 = vld [vmem:[#allocation8 + $0x28] sm:$0xf0]  ;;  %v637_v16 = vor.u32 %v819_v9, %v636_v8  ;;  %v834_v17 = vld [vmem:[#allocation8 + $0xa4] sm:$0xf] }
  0x29   :  { %394 = vmatpush.bf16.msrb.mxu0 %v665_v50  ;;  %369 = vmatpush.bf16.msra.mxu2 %v653_v56  ;;  %v702_v18 = vld [vmem:[#allocation8 + $0xa8] sm:$0xf0]  ;;  %v701_v19 = vor.u32 %v835_v12, %v700_v11  ;;  %v641_v20 = vor.u32 %v818_v14, %v638_v15  ;;  %v628_v22 = vld [vmem:[#allocation8 + $0x10] sm:$0xf]  ;;  %v817_v23 = vld [vmem:[#allocation8 + $0x14] sm:$0xf0] }
  0x2a   :  { %407 = vmatpush.bf16.msrb.mxu1 %v729_v53  ;;  %382 = vmatpush.bf16.msra.mxu3 %v717_v59  ;;  %v705_v21 = vor.u32 %v834_v17, %v702_v18  ;;  %v692_v24 = vld [vmem:[#allocation8 + $0x90] sm:$0xf]  ;;  %v629_v25 = vor.u32 %v817_v23, %v628_v22  ;;  %v833_v26 = vld [vmem:[#allocation8 + $0x94] sm:$0xf0]  ;;  %v816_v27 = vld [vmem:[#allocation8 + $0x14] sm:$0xf] }
  0x2b   :  { %v630_v28 = vld [vmem:[#allocation8 + $0x18] sm:$0xf0]  ;;  %v693_v29 = vor.u32 %v833_v26, %v692_v24  ;;  %v832_v31 = vld [vmem:[#allocation8 + $0x94] sm:$0xf]  ;;  %v620_v34 = vld [vmem:[#allocation8] sm:$0xf] }
  0x2c   :  { %v633_v30 = vor.u32 %v816_v27, %v630_v28  ;;  %v694_v32 = vld [vmem:[#allocation8 + $0x98] sm:$0xf0]  ;;  %v815_v35 = vld [vmem:[#allocation8 + $0x4] sm:$0xf0]  ;;  %v684_v36 = vld [vmem:[#allocation8 + $0x80] sm:$0xf] }
  0x2d   :  { %395 = vmatpush.bf16.msrb.mxu0 %v657_v62  ;;  %370 = vmatpush.bf16.msra.mxu2 %v645_v4  ;;  %v697_v33 = vor.u32 %v832_v31, %v694_v32  ;;  %v621_v37 = vor.u32 %v815_v35, %v620_v34  ;;  %v831_v38 = vld [vmem:[#allocation8 + $0x84] sm:$0xf0]  ;;  %v814_v39 = vld [vmem:[#allocation8 + $0x4] sm:$0xf]  ;;  %v622_v40 = vld [vmem:[#allocation8 + $0x8] sm:$0xf0] }
  0x2e   :  { %408 = vmatpush.bf16.msrb.mxu1 %v721_v1  ;;  %383 = vmatpush.bf16.msra.mxu3 %v709_v7  ;;  %v685_v41 = vor.u32 %v831_v38, %v684_v36  ;;  %v625_v42 = vor.u32 %v814_v39, %v622_v40  ;;  %v830_v43 = vld [vmem:[#allocation8 + $0x84] sm:$0xf]  ;;  %v686_v44 = vld [vmem:[#allocation8 + $0x88] sm:$0xf0]  ;;  %v861_v46 = vld [vmem:[#allocation10 + $0x78] sm:$0xff]  ;;  %s1034_s28 = smov [#allocation11]  }
  0x2f   :  { %v689_v45 = vor.u32 %v830_v43, %v686_v44  ;;  %v853_v47 = vld [vmem:[#allocation10 + $0x38] sm:$0xff]  ;;  %v860_v48 = vld [vmem:[#allocation10 + $0x70] sm:$0xff]  ;;  %v859_v50 = vld [vmem:[#allocation10 + $0x68] sm:$0xff]  ;;  %s586_s29 = sshll.u32 %s1034_s28, 4  ;;  %s588_s9 = sshll.u32 %s1108_s7, 4  ;;  %s587_s29 = int_to_ptr.vmem [resolvable:$true] %s586_s29  ;;  %s589_s9 = int_to_ptr.hbm [resolvable:$true] %s588_s9 }
  0x30   :  { %v852_v49 = vld [vmem:[#allocation10 + $0x30] sm:$0xff]  ;;  %v851_v51 = vld [vmem:[#allocation10 + $0x28] sm:$0xff]  ;;  %v858_v52 = vld [vmem:[#allocation10 + $0x60] sm:$0xff] }
  0x31   :  { %396 = vmatpush.bf16.msrb.mxu0 %v649_v10  ;;  %371 = vmatpush.bf16.msra.mxu2 %v637_v16  ;;  %v850_v53 = vld [vmem:[#allocation10 + $0x20] sm:$0xff]  ;;  %v857_v54 = vld [vmem:[#allocation10 + $0x58] sm:$0xff]  ;;  %v856_v56 = vld [vmem:[#allocation10 + $0x50] sm:$0xff] }
  0x32   :  { %409 = vmatpush.bf16.msrb.mxu1 %v713_v13  ;;  %384 = vmatpush.bf16.msra.mxu3 %v701_v19  ;;  %v108_v55 = vld [vmem:[#allocation7] sm:$0x3]  ;;  %v855_v6 = vld [vmem:[#allocation10 + $0x48] sm:$0xff]  ;;  %v848_v7 = vld [vmem:[#allocation10 + $0x10] sm:$0xff] }
  0x33   :  { %v110_v57 = vperm.slane %v108_v55, 0  ;;  %v111_v58 = vperm.slane %v108_v55, 1  ;;  %v849_v5 = vld [vmem:[#allocation10 + $0x18] sm:$0xff]  ;;  %v854_v8 = vld [vmem:[#allocation10 + $0x40] sm:$0xff]  ;;  %v847_v9 = vld [vmem:[#allocation10 + $0x8] sm:$0xff] }
  0x34   :  { %v846_v10 = vld [vmem:[#allocation10] sm:$0xff]  ;;  %v200_v11 = vld [vmem:[%s1105_s4] sm:$0x3] }
  0x35   :  { %397 = vmatpush.bf16.msrb.mxu0 %v641_v20  ;;  %372 = vmatpush.bf16.msra.mxu2 %v629_v25  ;;  %v203_v12 = vperm.slane %v200_v11, 1  ;;  %v202_v17 = vperm.slane %v200_v11, 0  ;;  %v872_v31 = vld [vmem:[%s1107_s6] ss:$0 sm:$0xff] }
  0x36   :  { %410 = vmatpush.bf16.msrb.mxu1 %v705_v21  ;;  %385 = vmatpush.bf16.msra.mxu3 %v693_v29 }
  0x39   :  { %398 = vmatpush.bf16.msrb.mxu0 %v633_v30  ;;  %373 = vmatpush.bf16.msra.mxu2 %v621_v37 }
  0x3a   :  { %411 = vmatpush.bf16.msrb.mxu1 %v697_v33  ;;  %386 = vmatpush.bf16.msra.mxu3 %v685_v41 }
  0x3d   :  { %399 = vmatpush.bf16.msrb.mxu0 %v625_v42  ;;  %554 = vmatpush.bf16.msrb.mxu2 %v853_v47 }
  0x3e   :  { %412 = vmatpush.bf16.msrb.mxu1 %v689_v45  ;;  %567 = vmatpush.bf16.msrb.mxu3 %v861_v46 }
  0x41   :  { %555 = vmatpush.bf16.msrb.mxu2 %v852_v49 }
  0x42   :  { %568 = vmatpush.bf16.msrb.mxu3 %v860_v48 }
  0x45   :  { %556 = vmatpush.bf16.msrb.mxu2 %v851_v51 }
  0x46   :  { %569 = vmatpush.bf16.msrb.mxu3 %v859_v50 }
  0x49   :  { %557 = vmatpush.bf16.msrb.mxu2 %v850_v53 }
  0x4a   :  { %570 = vmatpush.bf16.msrb.mxu3 %v858_v52 }
  0x4d   :  { %558 = vmatpush.bf16.msrb.mxu2 %v849_v5 }
  0x4e   :  { %571 = vmatpush.bf16.msrb.mxu3 %v857_v54 }
  0x51   :  { %559 = vmatpush.bf16.msrb.mxu2 %v848_v7 }
  0x52   :  { %572 = vmatpush.bf16.msrb.mxu3 %v856_v56 }
  0x55   :  { %560 = vmatpush.bf16.msrb.mxu2 %v847_v9 }
  0x56   :  { %573 = vmatpush.bf16.msrb.mxu3 %v855_v6 }
  0x59   :  { %561 = vmatpush.bf16.msrb.mxu2 %v846_v10 }
  0x5a   :  { %574 = vmatpush.bf16.msrb.mxu3 %v854_v8 }
  0x9d   :  { %v147_v59 = vpop.f32.mrf.mxu0 }
  0x9e   :  { %v148_v60 = vadd.f32 %v147_v59, %v110_v57 }
  0xa0   :  { %v160_v61 = vpop.f32.mrf.mxu1  ;;  %v164_v63 = vmax.f32 %v148_v60, 0.0 }
  0xa1   :  { %v161_v62 = vadd.f32 %v160_v61, %v111_v58 }
  0xa2   :  { %v166_v1 = vpack.c.bf16 %v164_v63, %v164_v63 }
  0xa3   :  { %v165_v0 = vmax.f32 %v161_v62, 0.0 }
  0xa4   :  { %374 = vmatmul.bf16.vlgmr.msra.gmra.mxu2 %v166_v1  ;;  %400 = vmatmul.bf16.vlgmr.msrb.gmra.mxu0 %v166_v1 }
  0xa5   :  { %v167_v2 = vpack.c.bf16 %v165_v0, %v165_v0  ;;  %v149_v3 = vpop.f32.mrf.mxu0 }
  0xa7   :  { %387 = vmatmul.bf16.vlgmr.msra.gmra.mxu3 %v167_v2  ;;  %413 = vmatmul.bf16.vlgmr.msrb.gmra.mxu1 %v167_v2 }
  0xa8   :  { %v162_v4 = vpop.f32.mrf.mxu1 }
 0x121   :  { %v401_v13 = vpop.f32.mrf.mxu0 }
 0x122   :  { %v402_v14 = vadd.f32 %v401_v13, %v203_v12 }
 0x124   :  { %v414_v15 = vpop.f32.mrf.mxu1 }
 0x125   :  { %v415_v16 = vadd.f32 %v414_v15, %v402_v14 }
 0x127   :  { %v419_v18 = vmax.f32 %v415_v16, 0.0  ;;  %v375_v19 = vpop.f32.mrf.mxu2 }
 0x128   :  { %v376_v21 = vadd.f32 %v375_v19, %v202_v17 }
 0x129   :  { %v421_v20 = vpack.c.bf16 %v419_v18, %v419_v18  ;;  %v403_v23 = vpop.f32.mrf.mxu0 }
 0x12a   :  { %v388_v22 = vpop.f32.mrf.mxu3 }
 0x12b   :  { %v389_v24 = vadd.f32 %v388_v22, %v376_v21  ;;  %575 = vmatmul.bf16.vlgmr.msrb.gmra.mxu3 %v421_v20 }
 0x12c   :  { %v416_v25 = vpop.f32.mrf.mxu1 }
 0x12d   :  { %v418_v26 = vmax.f32 %v389_v24, 0.0 }
 0x12f   :  { %v420_v27 = vpack.c.bf16 %v418_v26, %v418_v26  ;;  %v377_v28 = vpop.f32.mrf.mxu2 }
 0x131   :  { %562 = vmatmul.bf16.vlgmr.msrb.gmra.mxu2 %v420_v27 }
 0x132   :  { %v390_v29 = vpop.f32.mrf.mxu3 }
 0x1ae   :  { %v576_v30 = vpop.f32.mrf.mxu3 }
 0x1b4   :  { %v563_v32 = vpop.f32.mrf.mxu2 }
 0x1b5   :  { %v564_v33 = vadd.f32 %v872_v31, %v563_v32 }
 0x1b6   :  { %v578_v34 = vpop.f32.mrf.mxu3 }
 0x1b7   :  { %v577_v35 = vadd.f32 %v576_v30, %v564_v33 }
 0x1b9   :  { %580 = vst [vmem:[#allocation11] sm:$0xff] %v577_v35 }
 0x1ba   :  { %591 = dma.vmem_to_hbm [thread:$0]  %s587_s29, 128, %s589_s9, [#allocation4]  }
 0x1bc   :  { %v565_v36 = vpop.f32.mrf.mxu2 }
 0x1bd   :  { %1023 = dma.done.wait [#allocation4], 128  }
 0x1be   :  { %1024 = vsyncadd [#allocation4], 4294967168 }
 0x1bf   :  { %596 = vsyncpa [#allocation3], 1 }
 0x1c0   :  { %597 = vsyncpa [#allocation6], 1 }
 0x1c1   :  { %598 = vsyncpa [#allocation9], 1 }
 0x1c2   :  { %599 = vsyncpa [#allocation4], 1 }

</bundles_post_ra>
